<compile_context>
chip_gen: v7x
topology: tpu7x:2x2x1
jax: 0.10.0
libtpu: 0.0.40
codegen_flags: <defaults>
</compile_context>

<pallas_src>
import functools

import jax
import jax.numpy as jnp
from jax.experimental import pallas as pl
from jax.experimental.pallas import tpu as pltpu

LEAKY_SLOPE = 0.2
BN_EPS = 1e-5


def _round_up(x, m):
    return ((x + m - 1) // m) * m


def _gen_defaults():
    """Generation-dependent scoped-VMEM limit and matmul row-tile target."""
    vmem_cap = None
    try:
        vmem_cap = int(pltpu.get_tpu_info().vmem_capacity_bytes)
    except Exception:
        vmem_cap = None
    if not vmem_cap:
        try:
            kind = jax.devices()[0].device_kind.lower()
            vmem_cap = 64 * 2**20 if "v7" in kind else 128 * 2**20
        except Exception:
            vmem_cap = 64 * 2**20
    limit = max(32 * 2**20, min(100 * 2**20, (vmem_cap * 3) // 4))
    tm = 1024 if vmem_cap >= 96 * 2**20 else 512
    return limit, tm


_VMEM_LIMIT, _TM_TARGET = _gen_defaults()


@functools.lru_cache(maxsize=None)
def _buffered1_ok():
    """Probe whether pipeline_mode=pl.Buffered(1) (single-buffered resident operand) works."""
    try:
        def k(x_ref, o_ref):
            o_ref[...] = x_ref[...] * 2.0

        f = pl.pallas_call(
            k,
            out_shape=jax.ShapeDtypeStruct((16, 128), jnp.float32),
            grid=(2,),
            in_specs=[pl.BlockSpec((8, 128), lambda i: (0, 0),
                                   pipeline_mode=pl.Buffered(1))],
            out_specs=pl.BlockSpec((8, 128), lambda i: (i, 0)),
        )
        jax.block_until_ready(f(jnp.ones((8, 128), jnp.float32)))
        return True
    except Exception:
        return False


def _resident_spec(shape):
    """BlockSpec for a grid-invariant operand; single-buffered when supported."""
    rank = len(shape)
    idx = lambda *_: (0,) * rank
    if _buffered1_ok():
        return pl.BlockSpec(shape, idx, pipeline_mode=pl.Buffered(1))
    return pl.BlockSpec(shape, idx)


# --------------------------------------------------------------------------
# Kernels
# --------------------------------------------------------------------------
def _matmul_bias_act_kernel(x_ref, w_ref, b_ref, o_ref, *, leaky):
    """im2col matmul + bias (+ LeakyReLU) — only used for the tiny Cin=3 layer."""
    z = jnp.dot(x_ref[...], w_ref[...], preferred_element_type=jnp.float32)
    z = z + b_ref[...]
    if leaky:
        z = jnp.where(z > 0, z, LEAKY_SLOPE * z)
    o_ref[...] = z.astype(o_ref.dtype)


def _dconv_bias_act_kernel(src_ref, w_ref, b_ref, o_ref, acc_ref, *, offs, leaky):
    """Direct 3x3 conv tile: 9 shifted (TM, Cin)x(Cin, Cp) dots -> f32 VMEM acc."""
    tm = acc_ref.shape[0]
    m0 = pl.multiple_of(pl.program_id(1) * tm, 8)
    acc_ref[...] = jnp.zeros_like(acc_ref)
    for j, off in enumerate(offs):
        acc_ref[...] += jnp.dot(src_ref[0, pl.ds(m0 + off, tm), :], w_ref[j],
                                preferred_element_type=jnp.float32)
    z = acc_ref[...] + b_ref[0]
    if leaky:
        z = jnp.where(z > 0, z, LEAKY_SLOPE * z)
    o_ref[0] = z.astype(o_ref.dtype)


def _dconv_stats_kernel(src_ref, w_ref, mask_ref, z_ref, sum_ref, sumsq_ref,
                        acc_ref, *, offs):
    """BN pass 1: direct conv tile (bf16 z out) + masked f32 sum / sum-of-squares.

    Conv bias is skipped (exactly cancelled by the BN mean subtraction).
    """
    tm = acc_ref.shape[0]
    m0 = pl.multiple_of(pl.program_id(1) * tm, 8)
    acc_ref[...] = jnp.zeros_like(acc_ref)
    for j, off in enumerate(offs):
        acc_ref[...] += jnp.dot(src_ref[0, pl.ds(m0 + off, tm), :], w_ref[j],
                                preferred_element_type=jnp.float32)
    acc = acc_ref[...]
    z_ref[0] = acc.astype(z_ref.dtype)
    accm = acc * mask_ref[...]            # zero out garbage columns / padded rows
    s = jnp.sum(accm, axis=0, keepdims=True)
    ss = jnp.sum(accm * accm, axis=0, keepdims=True)
    sum_ref[0] = jnp.broadcast_to(s, sum_ref.shape[1:])
    sumsq_ref[0] = jnp.broadcast_to(ss, sumsq_ref.shape[1:])


def _scale_shift_act_kernel(z_ref, a_ref, c_ref, o_ref, *, leaky):
    """BN pass 2: y = LeakyReLU(a*z + c); z stored bf16, math in f32."""
    y = z_ref[...].astype(jnp.float32) * a_ref[...] + c_ref[...]
    if leaky:
        y = jnp.where(y > 0, y, LEAKY_SLOPE * y)
    o_ref[...] = y.astype(o_ref.dtype)


# --------------------------------------------------------------------------
# Glue: phase-decomposed flat activation for 3x3 / pad=1 convs
# --------------------------------------------------------------------------
def _build_conv_src(x, stride, tm_target, cp):
    """Spatially-padded, (stride-2) phase-decomposed, flattened activation.

    Each of the 9 conv taps becomes a contiguous row window of `src` at a static
    offset — no im2col, no HBM duplication of the activation.
    Returns (src (N, n_ph*Lph, Cin) bf16, offs[9], pitch, Ho, Wo, M_out, Mp, tm).
    """
    N, H, W, C = x.shape
    Ho = (H - 1) // stride + 1
    Wo = (W - 1) // stride + 1
    xp = jnp.pad(x, ((0, 0), (1, 1), (1, 1), (0, 0)))
    if stride == 1:
        Hph, Wph = H + 2, W + 2
        planes = [xp]

        def tap(kh, kw):
            return 0, kh * Wph + kw
    else:  # stride == 2: even/odd phase decomposition of the padded image
        Hph, Wph = (H + 3) // 2, (W + 3) // 2
        planes = []
        for p in range(2):
            for q in range(2):
                ph = xp[:, p::2, q::2, :]
                ph = jnp.pad(ph, ((0, 0), (0, Hph - ph.shape[1]),
                                  (0, Wph - ph.shape[2]), (0, 0)))
                planes.append(ph)

        def tap(kh, kw):
            return (kh % 2) * 2 + (kw % 2), (kh // 2) * Wph + (kw // 2)

    pitch = Wph
    M_out = Ho * pitch
    tm_eff = tm_target
    while tm_eff > 128 and tm_eff * cp * 4 > 4 * 2**20:   # bound the f32 acc tile
        tm_eff //= 2
    tm = min(tm_eff, _round_up(M_out, 8))
    Mp = _round_up(M_out, tm)

    max_intra = max(tap(kh, kw)[1] for kh in range(3) for kw in range(3))
    Lph = _round_up(Mp + max_intra + 8, 8)
    flat = [jnp.pad(pln.reshape(N, Hph * Wph, C),
                    ((0, 0), (0, Lph - Hph * Wph), (0, 0)))
            for pln in planes]
    src = flat[0] if len(flat) == 1 else jnp.concatenate(flat, axis=1)
    offs = tuple(tap(kh, kw)[0] * Lph + tap(kh, kw)[1]
                 for kh in range(3) for kw in range(3))
    return src, offs, pitch, Ho, Wo, M_out, Mp, tm


# --------------------------------------------------------------------------
# Per-layer wrappers
# --------------------------------------------------------------------------
def _conv_direct(x, w_taps, bias_p, gamma_p, beta_p, cout, *, stride, normalize,
                 leaky, out_dtype):
    """3x3 conv (pad 1) [+ training-mode BN] [+ LeakyReLU] without im2col."""
    N, _, _, Cin = x.shape
    Cp = w_taps.shape[-1]
    src, offs, pitch, Ho, Wo, M_out, Mp, tm = _build_conv_src(
        x.astype(jnp.bfloat16), stride, _TM_TARGET, Cp)
    nt = Mp // tm
    L = src.shape[1]

    src_spec = pl.BlockSpec((1, L, Cin), lambda n, t: (n, 0, 0))   # resident per image
    w_spec = _resident_spec((9, Cin, Cp))
    out_spec = pl.BlockSpec((1, tm, Cp), lambda n, t: (n, t, 0))
    grid = (N, nt)
    cparams = pltpu.CompilerParams(
        dimension_semantics=("parallel", "arbitrary"),
        vmem_limit_bytes=_VMEM_LIMIT)
    acc_scratch = pltpu.VMEM((tm, Cp), jnp.float32)

    if normalize:
        # Validity mask over the flat output rows (garbage cols / pad rows -> 0).
        ridx = jnp.arange(Mp)
        mask = (((ridx % pitch) < Wo) & (ridx < Ho * pitch)).astype(jnp.float32)
        mask = mask.reshape(Mp, 1)

        z, psum, psumsq = pl.pallas_call(
            functools.partial(_dconv_stats_kernel, offs=offs),
            out_shape=(jax.ShapeDtypeStruct((N, Mp, Cp), jnp.bfloat16),
                       jax.ShapeDtypeStruct((N, nt * 8, Cp), jnp.float32),
                       jax.ShapeDtypeStruct((N, nt * 8, Cp), jnp.float32)),
            grid=grid,
            in_specs=[src_spec, w_spec,
                      pl.BlockSpec((tm, 1), lambda n, t: (t, 0))],
            out_specs=(out_spec,
                       pl.BlockSpec((1, 8, Cp), lambda n, t: (n, t, 0)),
                       pl.BlockSpec((1, 8, Cp), lambda n, t: (n, t, 0))),
            scratch_shapes=[acc_scratch],
            compiler_params=cparams,
        )(src, w_taps, mask)

        # Global batch statistics (PyTorch training-mode BatchNorm, biased var).
        # TODO(synk): per-tile centered stats would avoid E[z^2]-E[z]^2 cancellation
        # for very large M; fine at these magnitudes with f32 sums.
        m_total = N * Ho * Wo
        s = psum.reshape(N, nt, 8, Cp)[:, :, 0, :].sum(axis=(0, 1))
        ss = psumsq.reshape(N, nt, 8, Cp)[:, :, 0, :].sum(axis=(0, 1))
        mean = s / m_total
        var = jnp.maximum(ss / m_total - mean * mean, 0.0)
        a = gamma_p * jax.lax.rsqrt(var + BN_EPS)
        c = beta_p - a * mean

        # Pass 2: fused scale/shift + LeakyReLU on bf16 z with a larger tile.
        g = max(d for d in range(1, nt + 1) if nt % d == 0 and d * tm <= 2048)
        tm2 = g * tm
        out = pl.pallas_call(
            functools.partial(_scale_shift_act_kernel, leaky=leaky),
            out_shape=jax.ShapeDtypeStruct((N, Mp, Cp), out_dtype),
            grid=(N, Mp // tm2),
            in_specs=[pl.BlockSpec((1, tm2, Cp), lambda n, t: (n, t, 0)),
                      _resident_spec((1, 1, Cp)),
                      _resident_spec((1, 1, Cp))],
            out_specs=pl.BlockSpec((1, tm2, Cp), lambda n, t: (n, t, 0)),
            compiler_params=pltpu.CompilerParams(
                dimension_semantics=("parallel", "parallel"),
                vmem_limit_bytes=_VMEM_LIMIT),
        )(z, a.reshape(1, 1, Cp), c.reshape(1, 1, Cp))
    else:
        out = pl.pallas_call(
            functools.partial(_dconv_bias_act_kernel, offs=offs, leaky=leaky),
            out_shape=jax.ShapeDtypeStruct((N, Mp, Cp), out_dtype),
            grid=grid,
            in_specs=[src_spec, w_spec, _resident_spec((1, 1, Cp))],
            out_specs=out_spec,
            scratch_shapes=[acc_scratch],
            compiler_params=cparams,
        )(src, w_taps, bias_p)

    out = out[:, :Ho * pitch, :].reshape(N, Ho, pitch, Cp)[:, :, :Wo, :cout]
    return out


def _im2col(x_nhwc, stride):
    """3x3 / pad=1 im2col — only for the Cin=3 first layer."""
    N, H, W, Cin = x_nhwc.shape
    Ho = (H - 1) // stride + 1
    Wo = (W - 1) // stride + 1
    xp = jnp.pad(x_nhwc, ((0, 0), (1, 1), (1, 1), (0, 0)))
    cols = []
    for kh in range(3):
        for kw in range(3):
            cols.append(xp[:, kh:kh + (Ho - 1) * stride + 1:stride,
                           kw:kw + (Wo - 1) * stride + 1:stride, :])
    patches = jnp.concatenate(cols, axis=-1)
    return patches.reshape(N * Ho * Wo, 9 * Cin), Ho, Wo


def _conv_im2col(x, Wc, bias_p, cout, *, stride, leaky, out_dtype):
    N = x.shape[0]
    Kp, Cp = Wc.shape
    X, Ho, Wo = _im2col(x.astype(jnp.bfloat16), stride)
    M, K = X.shape
    tm = min(_TM_TARGET, _round_up(M, 8))
    Mp = _round_up(M, tm)
    nt = Mp // tm
    X = jnp.pad(X, ((0, Mp - M), (0, Kp - K)))
    out = pl.pallas_call(
        functools.partial(_matmul_bias_act_kernel, leaky=leaky),
        out_shape=jax.ShapeDtypeStruct((Mp, Cp), out_dtype),
        grid=(nt,),
        in_specs=[pl.BlockSpec((tm, Kp), lambda i: (i, 0)),
                  _resident_spec((Kp, Cp)),
                  _resident_spec((1, Cp))],
        out_specs=pl.BlockSpec((tm, Cp), lambda i: (i, 0)),
        compiler_params=pltpu.CompilerParams(
            dimension_semantics=("parallel",), vmem_limit_bytes=_VMEM_LIMIT),
    )(X, Wc, bias_p)
    return out[:M, :cout].reshape(N, Ho, Wo, cout)


# --------------------------------------------------------------------------
# Full model
# --------------------------------------------------------------------------
# (out_filters, stride, normalize) ... then a final 3x3 conv -> 1 channel.
_BLOCK_CFG = [(64, 1, False), (64, 2, True), (128, 1, True), (128, 2, True),
              (256, 1, True), (256, 2, True), (512, 1, True), (512, 2, True)]


def init_params(key, in_channels=3):
    """Deterministic synthetic parameters (shapes match the PyTorch module)."""
    params = []
    cin = in_channels
    cfgs = _BLOCK_CFG + [(1, 1, False)]   # final conv: no BN, no activation
    for i, (cout, _stride, _norm) in enumerate(cfgs):
        k = jax.random.fold_in(key, i)
        kw_, kb, kg, kbeta = jax.random.split(k, 4)
        w = 0.05 * jax.random.normal(kw_, (cout, cin, 3, 3), jnp.float32)
        b = 0.05 * jax.random.normal(kb, (cout,), jnp.float32)
        gamma = 1.0 + 0.1 * jax.random.normal(kg, (cout,), jnp.float32)
        beta = 0.1 * jax.random.normal(kbeta, (cout,), jnp.float32)
        params.append((w, b, gamma, beta))
        cin = cout
    return params


def preprocess_params(params, in_channels=3):
    """One-time conversion of PyTorch-layout params to kernel-ready operands."""
    cfgs = _BLOCK_CFG + [(1, 1, False)]
    prepped = []
    cin = in_channels
    for i, (cout, stride, norm) in enumerate(cfgs):
        w, b, gamma, beta = params[i]
        cp = _round_up(cout, 128)
        if i == 0:
            k = 9 * cin
            kp = max(_round_up(k, 8), 128)
            wc = jnp.transpose(w, (2, 3, 1, 0)).reshape(k, cout).astype(jnp.bfloat16)
            wc = jnp.pad(wc, ((0, kp - k), (0, cp - cout)))
            bias = jnp.pad(b.astype(jnp.float32), (0, cp - cout)).reshape(1, cp)
            prepped.append(dict(kind="im2col", w=wc, b=bias, gamma=None, beta=None,
                                cout=cout, stride=stride, norm=norm))
        else:
            # (Cout, Cin, 3, 3) -> (kh, kw, Cin, Cout) -> (9, Cin, Cp) bf16
            wt = jnp.transpose(w, (2, 3, 1, 0)).reshape(9, cin, cout).astype(jnp.bfloat16)
            wt = jnp.pad(wt, ((0, 0), (0, 0), (0, cp - cout)))
            bias = jnp.pad(b.astype(jnp.float32), (0, cp - cout)).reshape(1, 1, cp)
            gp = jnp.pad(gamma.astype(jnp.float32), (0, cp - cout))
            bp = jnp.pad(beta.astype(jnp.float32), (0, cp - cout))
            prepped.append(dict(kind="direct", w=wt, b=bias, gamma=gp, beta=bp,
                                cout=cout, stride=stride, norm=norm))
        cin = cout
    return prepped


def discriminator_forward(img_nchw, prepped):
    """Forward pass. img_nchw: (N, C, H, W) f32 -> (N, 1, H/16, W/16) f32."""
    x = jnp.transpose(img_nchw, (0, 2, 3, 1)).astype(jnp.bfloat16)   # NCHW -> NHWC
    n_layers = len(prepped)
    for i, lp in enumerate(prepped):
        last = i == n_layers - 1
        leaky = not last                       # final conv has no activation
        out_dtype = jnp.float32 if last else jnp.bfloat16
        if lp["kind"] == "im2col":
            x = _conv_im2col(x, lp["w"], lp["b"], lp["cout"], stride=lp["stride"],
                             leaky=leaky, out_dtype=out_dtype)
        else:
            x = _conv_direct(x, lp["w"], lp["b"], lp["gamma"], lp["beta"],
                             lp["cout"], stride=lp["stride"], normalize=lp["norm"],
                             leaky=leaky, out_dtype=out_dtype)
    return jnp.transpose(x, (0, 3, 1, 2)).astype(jnp.float32)        # NHWC -> NCHW


if __name__ == "__main__":
    key = jax.random.PRNGKey(0)
    pkey, xkey = jax.random.split(key)

    N, C, H, W = 2, 3, 16, 16   # 16x16 -> four stride-2 convs -> 1x1 output map
    img = jax.random.normal(xkey, (N, C, H, W), jnp.float32)
    params = init_params(pkey, in_channels=C)
    prepped = preprocess_params(params, in_channels=C)

    out = discriminator_forward(img, prepped)
    out = jax.block_until_ready(out)

    assert out.shape == (N, 1, H // 16, W // 16), out.shape
    assert bool(jnp.all(jnp.isfinite(out)))
    print("KERNEL_OK")
</pallas_src>

<mosaic_0001>
module attributes {stable_mosaic.version = 11 : i64} {
  func.func @k(%arg0: i32, %arg1: memref<8x128xf32, #tpu.memory_space<vmem>>, %arg2: memref<8x128xf32, #tpu.memory_space<vmem>>) attributes {dimension_semantics = [#tpu.dimension_semantics<arbitrary>], iteration_bounds = array<i64: 2>, scalar_prefetch = 0 : i64, scratch_operands = 0 : i64, tpu.core_type = #tpu.core_type<tc>, window_params = [{pipeline_mode = #tpu.pipeline_mode<synchronous>, transform_indices = @transform_0, window_bounds = array<i64: 8, 128>}, {transform_indices = @transform_1, window_bounds = array<i64: 8, 128>}]} {
    %c0 = arith.constant 0 : index
    %c0_0 = arith.constant 0 : index
    %0 = vector.load %arg1[%c0, %c0_0] : memref<8x128xf32, #tpu.memory_space<vmem>>, vector<8x128xf32>
    %cst = arith.constant 2.000000e+00 : f32
    %1 = vector.broadcast %cst : f32 to vector<8x128xf32>
    %2 = arith.mulf %0, %1 : vector<8x128xf32>
    %c0_1 = arith.constant 0 : index
    %c0_2 = arith.constant 0 : index
    %3 = vector.load %arg2[%c0_1, %c0_2] : memref<8x128xf32, #tpu.memory_space<vmem>>, vector<8x128xf32>
    tpu.vector_store %arg2[%c0_1, %c0_2], %2 {strides = array<i32>} : memref<8x128xf32, #tpu.memory_space<vmem>>, vector<8x128xf32>,
    return
  }
  func.func @transform_0(%arg0: i32) -> (i32, i32) {
    %c0_i32 = arith.constant 0 : i32
    %c0_i32_0 = arith.constant 0 : i32
    %c0_i32_1 = arith.constant 0 : i32
    return %c0_i32, %c0_i32_0 : i32, i32
  }
  func.func @transform_1(%arg0: i32) -> (i32, i32) {
    %c0_i32 = arith.constant 0 : i32
    %c0_i32_0 = arith.constant 0 : i32
    return %arg0, %c0_i32 : i32, i32
  }
}

module attributes {stable_mosaic.version = 11 : i64} {
  func.func @_matmul_bias_act_kernel(%arg0: i32, %arg1: memref<512x128xbf16, #tpu.memory_space<vmem>>, %arg2: memref<128x128xbf16, #tpu.memory_space<vmem>>, %arg3: memref<1x128xf32, #tpu.memory_space<vmem>>, %arg4: memref<512x128xbf16, #tpu.memory_space<vmem>>) attributes {dimension_semantics = [#tpu.dimension_semantics<parallel>], iteration_bounds = array<i64: 1>, scalar_prefetch = 0 : i64, scratch_operands = 0 : i64, tpu.core_type = #tpu.core_type<tc>, window_params = [{transform_indices = @transform_0, window_bounds = array<i64: 512, 128>}, {pipeline_mode = #tpu.pipeline_mode<synchronous>, transform_indices = @transform_1, window_bounds = array<i64: 128, 128>}, {pipeline_mode = #tpu.pipeline_mode<synchronous>, transform_indices = @transform_2, window_bounds = array<i64: 1, 128>}, {transform_indices = @transform_3, window_bounds = array<i64: 512, 128>}]} {
    %c0 = arith.constant 0 : index
    %c0_0 = arith.constant 0 : index
    %0 = vector.load %arg1[%c0, %c0_0] : memref<512x128xbf16, #tpu.memory_space<vmem>>, vector<512x128xbf16>
    %c0_1 = arith.constant 0 : index
    %c0_2 = arith.constant 0 : index
    %1 = vector.load %arg2[%c0_1, %c0_2] : memref<128x128xbf16, #tpu.memory_space<vmem>>, vector<128x128xbf16>
    %cst = arith.constant dense<0.000000e+00> : vector<512x128xf32>
    %2 = tpu.matmul %0, %1, %cst {dimension_numbers = #tpu.dot_dimension_numbers<[1], [0], [0], [1], [0, 0, 1, 1], [], []>} : vector<512x128xbf16>, vector<128x128xbf16>, vector<512x128xf32> -> vector<512x128xf32>
    %c0_3 = arith.constant 0 : index
    %c0_4 = arith.constant 0 : index
    %3 = vector.load %arg3[%c0_3, %c0_4] : memref<1x128xf32, #tpu.memory_space<vmem>>, vector<1x128xf32>
    %4 = vector.broadcast %3 : vector<1x128xf32> to vector<512x128xf32>
    %5 = arith.addf %2, %4 : vector<512x128xf32>
    %cst_5 = arith.constant 0.000000e+00 : f32
    %6 = vector.broadcast %cst_5 : f32 to vector<512x128xf32>
    %7 = arith.cmpf ogt, %5, %6 : vector<512x128xf32>
    %cst_6 = arith.constant 2.000000e-01 : f32
    %8 = vector.broadcast %cst_6 : f32 to vector<512x128xf32>
    %9 = arith.mulf %8, %5 : vector<512x128xf32>
    %10 = arith.select %7, %5, %9 : vector<512x128xi1>, vector<512x128xf32>
    %11 = arith.truncf %10 : vector<512x128xf32> to vector<512x128xbf16>
    %c0_7 = arith.constant 0 : index
    %c0_8 = arith.constant 0 : index
    %12 = vector.load %arg4[%c0_7, %c0_8] : memref<512x128xbf16, #tpu.memory_space<vmem>>, vector<512x128xbf16>
    tpu.vector_store %arg4[%c0_7, %c0_8], %11 {strides = array<i32>} : memref<512x128xbf16, #tpu.memory_space<vmem>>, vector<512x128xbf16>,
    return
  }
  func.func @transform_0(%arg0: i32) -> (i32, i32) {
    %c0_i32 = arith.constant 0 : i32
    %c0_i32_0 = arith.constant 0 : i32
    return %arg0, %c0_i32 : i32, i32
  }
  func.func @transform_1(%arg0: i32) -> (i32, i32) {
    %c0_i32 = arith.constant 0 : i32
    %c0_i32_0 = arith.constant 0 : i32
    %c0_i32_1 = arith.constant 0 : i32
    return %c0_i32, %c0_i32_0 : i32, i32
  }
  func.func @transform_2(%arg0: i32) -> (i32, i32) {
    %c0_i32 = arith.constant 0 : i32
    %c0_i32_0 = arith.constant 0 : i32
    %c0_i32_1 = arith.constant 0 : i32
    return %c0_i32, %c0_i32_0 : i32, i32
  }
  func.func @transform_3(%arg0: i32) -> (i32, i32) {
    %c0_i32 = arith.constant 0 : i32
    %c0_i32_0 = arith.constant 0 : i32
    return %arg0, %c0_i32 : i32, i32
  }
}

</mosaic_0001>

<bundles_post_ra>
// kernel: tpu_custom_call.1
= control target key start
LH: loop header
LB: loop body
LE: loop exit
PB: predicated region body
PF: predicated region fallthrough
CT: control target
= control target key end

     0   :  { %6 = vsyncpa [#allocation3], 0  ;;  %s482_s0 = inlined_call_operand.hbm [shape: f32[8,128], index: 0, kind: input, shape index: {}]   ;;  %s483_s1 = inlined_call_operand.hbm [shape: f32[16,128], index: 1, kind: output, shape index: {}]  }
   0x1   :  { %7 = vsyncpa [#allocation4], 0 }
   0x2   :  { %9 = vsyncpa [#allocation4 + $0x1], 0  ;;  %s352_s6 = smov 0   ;;  %s354_s7 = smov 0  }
   0x3   :  { %s356_s8 = smov 0   ;;  %s358_s9 = smov 0  }
   0x4 LB: > { %s373_s10 = sadd.s32 4294967295, %s338_s9   ;;  %s184_s11 = sadd.s32 4294967294, %s338_s9   ;;  %s338_s9 = sphi %s358_s9, %s499_s9   ;;  %s334_s8 = sphi %s356_s8, %s498_s8   ;;  %s330_s7 = sphi %s354_s7, %s497_s7   ;;  %s326_s6 = sphi %s352_s6, %s496_s6  }
   0x5   : > { %s377_s12 = sadd.s32 1, %s338_s9   ;;  %s43_s13 = sadd.s32 1, %s334_s8 }
   0x6   : > { %s40_s14 = ssub.s32 %s338_s9, %s377_s12  ;;  %p53_p0 = scmp.ne.s32.totalorder %s334_s8, %s330_s7 }
   0x7   : > { %p41_p1 = scmp.eq.s32.totalorder %s40_s14, 0  ;;  %p54_p2 = scmp.eq.s32.totalorder %s373_s10, 1 }
   0x8   : > { %p59_p3 = scmp.ne.s32.totalorder %s330_s7, %s326_s6  ;;  %p60_p4 = scmp.eq.s32.totalorder %s184_s11, 1 }
   0x9   : > { %s388_s15 = scalar_select %p41_p1, %s334_s8, %s43_s13  }
   0xa   : > { %p390_p5 = por %p54_p2, %p53_p0  ;;  %p394_p6 = por %p60_p4, %p59_p3 }
   0xb   : > { %p185_p7 = scmp.ge.s32.totalorder %s338_s9, 1  ;;  %p67_p8 = scmp.lt.s32.totalorder %s338_s9, 3 }
   0xc   : > { %s487_s16 = scalar_select %p390_p5, 1, 0 }
   0xd   : > { %s488_s17 = scalar_select %p394_p6, 1, 0 }
   0xe   : > { %p484_p9 = scmp.eq.s32.totalorder %s373_s10, 0  ;;  %p401_p10 = pnand %p185_p7, %p67_p8 }
   0xf   : > { %s340_s19 = smov [#allocation2]   ;;  %s244_s24 = scalar_lea.hbm %s482_s0, 128 }
  0x10   : > { %s489_s18 = scalar_select %p401_p10, 1, 0 }
  0x11   : > { %s80_s20 = sshll.u32 %s340_s19, 4  ;;  %p200_p11 = pneg %p401_p10  ;;  %s81_s20 = int_to_ptr.vmem [resolvable:$true] %s80_s20 }
  0x12   : > { %p245_p13 = scmp.ne.s32.totalorder %s482_s0, %s244_s24  ;;  %p251_p3 = scmp.lt.u32.totalorder %s244_s24, %s482_s0 }
  0x13   : > { %p409_p12 = pnand %p484_p9, %p200_p11 }
  0x15   : > { %p246_p0 = pneg %p409_p12 }
  0x17   : > { %p247_p1 = pnand %p246_p0, %p245_p13 }
  0x19   : > { %p248_p2 = pneg %p247_p1 }
  0x1b   : > { %p253_p4 = pnand %p251_p3, %p248_p2 }
  0x1d   : > { %256 = shalt.err (!%p253_p4)
}
  0x1e   : > { %s257_s29 = scalar_lea.vmem %s81_s20, 128  ;;  %p265_p9 = scmp.lt.s32.totalorder %s81_s20, %s81_s20 }
  0x1f   : > { %p258_p7 = scmp.ne.s32.totalorder %s81_s20, %s257_s29  ;;  %p266_p6 = scmp.lt.s32.totalorder %s257_s29, %s257_s29 }
  0x21   : > { %p260_p8 = pnand %p258_p7, %p246_p0  ;;  %p267_p5 = por %p266_p6, %p265_p9 }
  0x23   : > { %p261_p11 = pneg %p260_p8 }
  0x25   : > { %p268_p10 = pnand %p267_p5, %p261_p11 }
  0x27   : > { %271 = shalt.err (!%p268_p10)
}
  0x28   : > { %203 = dma.hbm_to_vmem [thread:$0]  (!%p409_p12), %s482_s0, 128, %s81_s20, [#allocation3]  }
  0x29   : > { %p491_p13 = scmp.ne.s32.totalorder %s489_s18, 0 }
  0x2a   : > { %p492_p1 = scmp.eq.s32.totalorder (!%p491_p13), %s373_s10, 0 }
  0x2b   : > { %93 = sbr.rel (%p491_p13) target bundleno = 77 (0x4d), region = 24 }
  0x32   : > { %317 = dma.done.wait (%p492_p1), [#allocation3], 128   ;;  %p493_p0 = pmov %p492_p1 }
  0x33   : > { %s105_s3 = sand.u32 1, %s330_s7   ;;  %s191_s13 = sshll.u32 %s373_s10, 7  ;;  %v108_v0 = vld [vmem:[#allocation2] sm:$0xff] }
  0x34   : > { %319 = vsyncadd (%p493_p0), [#allocation3], 4294967168  ;;  %s189_s4 = sshll.u32 %s105_s3, 3  ;;  %v109_v1 = vmul.f32 2.0, %v108_v0  ;;  %s442_s19 = scalar_lea.hbm %s483_s1, %s191_s13 }
  0x35   : > { %s107_s5 = scalar_lea.vmem [#allocation5], %s189_s4  ;;  %s112_s20 = scalar_lea.sflag [#allocation4], %s105_s3 }
  0x36   : > { %s125_s11 = sshll.u32 %s107_s5, 4  ;;  %110 = vst [vmem:[%s107_s5] sm:$0xff] %v109_v1  ;;  %p494_p6 = scmp.ne.s32.totalorder %s487_s16, 0  ;;  %s437_s11 = int_to_ptr.vmem [resolvable:$true] %s125_s11 }
  0x37   : > { %s272_s21 = scalar_lea.vmem %s437_s11, 128  ;;  %s341_s10 = smov [#allocation5]  }
  0x38   : > { %p273_p5 = scmp.ne.s32.totalorder %s437_s11, %s272_s21  ;;  %s276_s22 = sshll.u32 %s341_s10, 4  ;;  %s277_s22 = int_to_ptr.vmem [resolvable:$false] %s276_s22 }
  0x39   : > { %s278_s23 = scalar_lea.vmem %s277_s22, 256  ;;  %p279_p12 = scmp.lt.s32.totalorder %s437_s11, %s277_s22 }
  0x3a   : > { %p274_p9 = pnand %p273_p5, %p494_p6  ;;  %p280_p2 = scmp.lt.s32.totalorder %s278_s23, %s272_s21 }
  0x3c   : > { %p275_p10 = pneg %p274_p9  ;;  %p281_p3 = por %p280_p2, %p279_p12 }
  0x3e   : > { %p282_p4 = pnand %p281_p3, %p275_p10 }
  0x40   : > { %285 = shalt.err (!%p282_p4)
}
  0x41   : > { %s286_s24 = scalar_lea.hbm %s442_s19, 128  ;;  %s290_s27 = scalar_lea.hbm %s483_s1, 256 }
  0x42   : > { %p287_p7 = scmp.ne.s32.totalorder %s442_s19, %s286_s24  ;;  %p291_p13 = scmp.lt.u32.totalorder %s442_s19, %s483_s1 }
  0x43   : > { %p292_p1 = scmp.lt.u32.totalorder %s290_s27, %s286_s24  ;;  %p294_p5 = scmp.lt.u32.totalorder %s286_s24, %s442_s19 }
  0x44   : > { %p288_p8 = pnand %p287_p7, %p494_p6 }
  0x45   : > { %p293_p0 = por %p292_p1, %p291_p13 }
  0x46   : > { %p289_p11 = pneg %p288_p8 }
  0x47   : > { %p295_p9 = por %p294_p5, %p293_p0 }
  0x49   : > { %p296_p10 = pnand %p295_p9, %p289_p11 }
  0x4b   : > { %299 = shalt.err (!%p296_p10)
}
  0x4c   : > { %198 = dma.vmem_to_hbm [thread:$0]  (%p494_p6), %s437_s11, 128, %s442_s19, %s112_s20  }
  0x4d PF: > { %p210_p12 = scmp.ge.s32.totalorder %s338_s9, 2  ;;  %s137_s30 = sand.u32 1, %s326_s6  }
  0x4e   : > { %p495_p2 = scmp.ne.s32.totalorder %s488_s17, 0  ;;  %s138_s2 = scalar_lea.sflag [#allocation4], %s137_s30 }
  0x50   : > { %p205_p3 = pnand %p210_p12, %p495_p2 }
  0x52   : > { %321 = dma.done.wait (!%p205_p3), %s138_s2, 128  }
  0x53   : > { %323 = vsyncadd (!%p205_p3), %s138_s2, 4294967168  ;;  %p12_p4 = scmp.ge.s32.totalorder %s377_s12, 4   ;;  %s496_s6 = smov %s330_s7 }
  0x54   : > { %s497_s7 = smov %s334_s8  ;;  %s498_s8 = smov %s388_s15 }
  0x55   : > { %s499_s9 = smov %s377_s12  ;;  %14 = sbr.rel (!%p12_p4) target bundleno = 4 (0x4), region = 61 }
  0x5c   :  { %143 = vsyncpa [#allocation3], 1 }
  0x5d   :  { %145 = vsyncpa [#allocation3 + $0x1], 1 }
  0x5e   :  { %146 = vsyncpa [#allocation4], 1 }
  0x5f   :  { %148 = vsyncpa [#allocation4 + $0x1], 1 }

// kernel: tpu_custom_call.1
= control target key start
LH: loop header
LB: loop body
LE: loop exit
PB: predicated region body
PF: predicated region fallthrough
CT: control target
= control target key end

     0   :  { %8 = vsyncpa [#allocation3], 0  ;;  %s2003_s0 = inlined_call_operand.hbm [shape: bf16[512,128], index: 0, kind: input, shape index: {}]   ;;  %s2004_s1 = inlined_call_operand.hbm [shape: bf16[128,128], index: 1, kind: input, shape index: {}]   ;;  %s2005_s2 = inlined_call_operand.hbm [shape: f32[1,128], index: 2, kind: input, shape index: {}]   ;;  %s2006_s3 = inlined_call_operand.hbm [shape: bf16[512,128], index: 3, kind: output, shape index: {}]  }
   0x1   :  { %9 = vsyncpa [#allocation6], 0 }
   0x2   :  { %10 = vsyncpa [#allocation4], 0  ;;  %s1837_s12 = smov [#allocation5]   ;;  %s1838_s14 = smov [#allocation2]  }
   0x3   :  { %s28_s13 = sshll.u32 %s1837_s12, 4  ;;  %s16_s15 = sshll.u32 %s1838_s14, 4  ;;  %s29_s13 = int_to_ptr.vmem [resolvable:$true] %s28_s13  ;;  %s1863_s15 = int_to_ptr.vmem [resolvable:$true] %s16_s15 }
   0x4   :  { %s1743_s18 = scalar_lea.hbm %s2004_s1, 1024 }
   0x5   :  { %p1744_p0 = scmp.ne.s32.totalorder %s2004_s1, %s1743_s18  ;;  %p1747_p1 = scmp.lt.u32.totalorder %s1743_s18, %s2004_s1 }
   0x7   :  { %p1749_p2 = pnand %p1747_p1, %p1744_p0 }
   0x9   :  { %1752 = shalt.err (!%p1749_p2)
}
   0xa   :  { %s1753_s23 = scalar_lea.vmem %s29_s13, 1024  ;;  %p1758_p4 = scmp.lt.s32.totalorder %s29_s13, %s29_s13 }
   0xb   :  { %p1754_p3 = scmp.ne.s32.totalorder %s29_s13, %s1753_s23  ;;  %p1759_p5 = scmp.lt.s32.totalorder %s1753_s23, %s1753_s23 }
   0xd   :  { %p1760_p6 = por %p1759_p5, %p1758_p4 }
   0xf   :  { %p1761_p7 = pnand %p1760_p6, %p1754_p3 }
  0x11   :  { %1764 = shalt.err (!%p1761_p7)
}
  0x12   :  { %s1839_s24 = smov 64   ;;  %s1840_s25 = smov 4  }
  0x13   :  { %34 = dma.hbm_to_vmem [thread:$0]  %s2004_s1, 1024, %s29_s13, [#allocation6], %s1839_s24, %s1839_s24, %s1840_s25  }
  0x14   :  { %s1765_s30 = scalar_lea.hbm %s2003_s0, 4096 }
  0x15   :  { %p1766_p8 = scmp.ne.s32.totalorder %s2003_s0, %s1765_s30  ;;  %p1769_p9 = scmp.lt.u32.totalorder %s1765_s30, %s2003_s0 }
  0x17   :  { %p1771_p10 = pnand %p1769_p9, %p1766_p8 }
  0x19   :  { %1774 = shalt.err (!%p1771_p10)
}
  0x1a   :  { %s1775_s8 = scalar_lea.vmem %s1863_s15, 4096  ;;  %p1780_p12 = scmp.lt.s32.totalorder %s1863_s15, %s1863_s15 }
  0x1b   :  { %p1776_p11 = scmp.ne.s32.totalorder %s1863_s15, %s1775_s8  ;;  %p1781_p13 = scmp.lt.s32.totalorder %s1775_s8, %s1775_s8 }
  0x1d   :  { %p1782_p0 = por %p1781_p13, %p1780_p12 }
  0x1f   :  { %p1783_p1 = pnand %p1782_p0, %p1776_p11 }
  0x21   :  { %1786 = shalt.err (!%p1783_p1)
}
  0x22   :  { %22 = dma.hbm_to_vmem [thread:$0]  %s2003_s0, 4096, %s1863_s15, [#allocation3], %s1839_s24, %s1839_s24, %s1840_s25  }
  0x23   :  { %s1841_s10 = smov [#allocation7]   ;;  %s1787_s14 = scalar_lea.hbm %s2005_s2, 16 }
  0x24   :  { %s41_s11 = sshll.u32 %s1841_s10, 4  ;;  %p1788_p2 = scmp.ne.s32.totalorder %s2005_s2, %s1787_s14  ;;  %s42_s11 = int_to_ptr.vmem [resolvable:$true] %s41_s11 }
  0x25   :  { %p1791_p3 = scmp.lt.u32.totalorder %s1787_s14, %s2005_s2 }
  0x27   :  { %p1793_p4 = pnand %p1791_p3, %p1788_p2 }
  0x29   :  { %1796 = shalt.err (!%p1793_p4)
}
  0x2a   :  { %s1797_s20 = scalar_lea.vmem %s42_s11, 16  ;;  %s1801_s0 = scalar_lea.vmem %s42_s11, 32 }
  0x2b   :  { %p1798_p5 = scmp.ne.s32.totalorder %s42_s11, %s1797_s20  ;;  %p1802_p6 = scmp.lt.s32.totalorder %s42_s11, %s42_s11 }
  0x2c   :  { %p1803_p7 = scmp.lt.s32.totalorder %s1801_s0, %s1797_s20 }
  0x2e   :  { %p1804_p8 = por %p1803_p7, %p1802_p6 }
  0x30   :  { %p1805_p9 = pnand %p1804_p8, %p1798_p5 }
  0x32   :  { %1808 = shalt.err (!%p1805_p9)
}
  0x33   :  { %44 = dma.hbm_to_vmem [thread:$0]  %s2005_s2, 16, %s42_s11, [#allocation6]  }
  0x34   :  { %1831 = dma.done.wait [#allocation3], 4096  }
  0x35   :  { %1832 = vsyncadd [#allocation3], 4294963200 }
  0x36   :  { %1833 = dma.done.wait [#allocation6], 1040  }
  0x37   :  { %1834 = vsyncadd [#allocation6], 4294966256  ;;  %v1703_v0 = vld [vmem:[#allocation5] sm:$0xff]   ;;  %v1704_v1 = vld [vmem:[#allocation5 + $0x8] sm:$0xff]   ;;  %s1842_s2 = smov [#allocation8]  }
  0x38   :  { %1601 = vmatprep.subr.bf16.mxu0 %v1703_v0  ;;  %1681 = vmatprep.subr.bf16.mxu1 %v1703_v0  ;;  %v1705_v2 = vld [vmem:[#allocation5 + $0x10] sm:$0xff]   ;;  %v1706_v3 = vld [vmem:[#allocation5 + $0x18] sm:$0xff]   ;;  %v1711_v4 = vld [vmem:[#allocation2] sm:$0xff]   ;;  %s1188_s22 = sshll.u32 %s1842_s2, 4  ;;  %s1189_s22 = int_to_ptr.vmem [resolvable:$true] %s1188_s22 }
  0x39   :  { %1602 = vmatpush3.bf16.msra.mxu0 %v1703_v0  ;;  %1689 = vmatpush3.bf16.msra.mxu1 %v1703_v0  ;;  %v1712_v5 = vld [vmem:[#allocation2 + $0x80] sm:$0xff]   ;;  %v1708_v7 = vld [vmem:[#allocation5 + $0x28] sm:$0xff]   ;;  %v1709_v8 = vld [vmem:[#allocation5 + $0x30] sm:$0xff]   ;;  %s1809_s23 = scalar_lea.vmem %s1189_s22, 4096  ;;  %p1814_p11 = scmp.lt.s32.totalorder %s1189_s22, %s1189_s22 }
  0x3a   :  { %1603 = vmatprep.subr.bf16.mxu0 %v1704_v1  ;;  %1682 = vmatprep.subr.bf16.mxu1 %v1704_v1  ;;  %v1707_v6 = vld [vmem:[#allocation5 + $0x20] sm:$0xff]   ;;  %v1710_v9 = vld [vmem:[#allocation5 + $0x38] sm:$0xff]   ;;  %v1713_v10 = vld [vmem:[#allocation2 + $0x8] sm:$0xff]   ;;  %p1810_p10 = scmp.ne.s32.totalorder %s1189_s22, %s1809_s23  ;;  %p1815_p12 = scmp.lt.s32.totalorder %s1809_s23, %s1809_s23 }
  0x3b   :  { %1617 = vmatprep.mubr.bf16.mxu0 %v1711_v4  ;;  %1649 = vmatprep.mubr.bf16.mxu1 %v1712_v5  ;;  %v1714_v11 = vld [vmem:[#allocation2 + $0x88] sm:$0xff]   ;;  %v1715_v12 = vld [vmem:[#allocation2 + $0x10] sm:$0xff]   ;;  %v1717_v14 = vld [vmem:[#allocation2 + $0x18] sm:$0xff]  }
  0x3c   :  { %v1716_v13 = vld [vmem:[#allocation2 + $0x90] sm:$0xff]   ;;  %v1718_v15 = vld [vmem:[#allocation2 + $0x98] sm:$0xff]   ;;  %v1719_v16 = vld [vmem:[#allocation2 + $0x20] sm:$0xff]   ;;  %p1816_p13 = por %p1815_p12, %p1814_p11 }
  0x3d   :  { %1604 = vmatpush3.bf16.msra.mxu0 %v1704_v1  ;;  %1690 = vmatpush3.bf16.msra.mxu1 %v1704_v1  ;;  %v1720_v17 = vld [vmem:[#allocation2 + $0xa0] sm:$0xff]   ;;  %v1721_v18 = vld [vmem:[#allocation2 + $0x28] sm:$0xff]   ;;  %v1723_v20 = vld [vmem:[#allocation2 + $0x30] sm:$0xff]  }
  0x3e   :  { %1605 = vmatprep.subr.bf16.mxu0 %v1705_v2  ;;  %1683 = vmatprep.subr.bf16.mxu1 %v1705_v2  ;;  %v1722_v19 = vld [vmem:[#allocation2 + $0xa8] sm:$0xff]   ;;  %v1724_v21 = vld [vmem:[#allocation2 + $0xb0] sm:$0xff]   ;;  %v1725_v22 = vld [vmem:[#allocation2 + $0x38] sm:$0xff]   ;;  %p1817_p0 = pnand %p1816_p13, %p1810_p10 }
  0x3f   :  { %v1726_v23 = vld [vmem:[#allocation2 + $0xb8] sm:$0xff]   ;;  %v1727_v24 = vld [vmem:[#allocation2 + $0x40] sm:$0xff]   ;;  %v1729_v26 = vld [vmem:[#allocation2 + $0x48] sm:$0xff]  }
  0x40   :  { %v1728_v25 = vld [vmem:[#allocation2 + $0xc0] sm:$0xff]   ;;  %v1730_v27 = vld [vmem:[#allocation2 + $0xc8] sm:$0xff]   ;;  %v1731_v28 = vld [vmem:[#allocation2 + $0x50] sm:$0xff]  }
  0x41   :  { %1606 = vmatpush3.bf16.msra.mxu0 %v1705_v2  ;;  %1691 = vmatpush3.bf16.msra.mxu1 %v1705_v2  ;;  %v1732_v29 = vld [vmem:[#allocation2 + $0xd0] sm:$0xff]   ;;  %v1733_v30 = vld [vmem:[#allocation2 + $0x58] sm:$0xff]   ;;  %v1735_v32 = vld [vmem:[#allocation2 + $0x60] sm:$0xff]  }
  0x42   :  { %1607 = vmatprep.subr.bf16.mxu0 %v1706_v3  ;;  %1684 = vmatprep.subr.bf16.mxu1 %v1706_v3  ;;  %v1734_v31 = vld [vmem:[#allocation2 + $0xd8] sm:$0xff]   ;;  %v1736_v33 = vld [vmem:[#allocation2 + $0xe0] sm:$0xff]   ;;  %v1737_v34 = vld [vmem:[#allocation2 + $0x68] sm:$0xff]  }
  0x43   :  { %v1738_v35 = vld [vmem:[#allocation2 + $0xe8] sm:$0xff]   ;;  %v1739_v36 = vld [vmem:[#allocation2 + $0x70] sm:$0xff]   ;;  %v1741_v38 = vld [vmem:[#allocation2 + $0x78] sm:$0xff]  }
  0x44   :  { %v1740_v37 = vld [vmem:[#allocation2 + $0xf0] sm:$0xff]   ;;  %v1742_v39 = vld [vmem:[#allocation2 + $0xf8] sm:$0xff]   ;;  %v1912_v40 = vld [vmem:[#allocation7] ss:$0 sm:$0xff] }
  0x45   :  { %1608 = vmatpush3.bf16.msra.mxu0 %v1706_v3  ;;  %1692 = vmatpush3.bf16.msra.mxu1 %v1706_v3 }
  0x46   :  { %1609 = vmatprep.subr.bf16.mxu0 %v1707_v6  ;;  %1685 = vmatprep.subr.bf16.mxu1 %v1707_v6 }
  0x49   :  { %1610 = vmatpush3.bf16.msra.mxu0 %v1707_v6  ;;  %1693 = vmatpush3.bf16.msra.mxu1 %v1707_v6 }
  0x4a   :  { %1611 = vmatprep.subr.bf16.mxu0 %v1708_v7  ;;  %1686 = vmatprep.subr.bf16.mxu1 %v1708_v7 }
  0x4d   :  { %1612 = vmatpush3.bf16.msra.mxu0 %v1708_v7  ;;  %1694 = vmatpush3.bf16.msra.mxu1 %v1708_v7 }
  0x4e   :  { %1613 = vmatprep.subr.bf16.mxu0 %v1709_v8  ;;  %1687 = vmatprep.subr.bf16.mxu1 %v1709_v8 }
  0x51   :  { %1614 = vmatpush3.bf16.msra.mxu0 %v1709_v8  ;;  %1695 = vmatpush3.bf16.msra.mxu1 %v1709_v8 }
  0x52   :  { %1615 = vmatprep.subr.bf16.mxu0 %v1710_v9  ;;  %1688 = vmatprep.subr.bf16.mxu1 %v1710_v9 }
  0x55   :  { %1616 = vmatpush3.bf16.msra.mxu0 %v1710_v9  ;;  %1696 = vmatpush3.bf16.msra.mxu1 %v1710_v9 }
  0x58   :  { %1618 = vmatmul.mubr.bf16.vlgmr.msra.gmra.mrb[0].mxu0 %v1713_v10  ;;  %1650 = vmatmul.mubr.bf16.vlgmr.msra.gmra.mrb[0].mxu1 %v1714_v11 }
  0x59   :  { %1621 = vmatprep.mubr.bf16.mxu0 %v1715_v12  ;;  %1653 = vmatprep.mubr.bf16.mxu1 %v1716_v13 }
  0x60   :  { %1622 = vmatmul.mubr.bf16.gmra.mrb[4].mxu0 %v1717_v14  ;;  %1654 = vmatmul.mubr.bf16.gmra.mrb[4].mxu1 %v1718_v15 }
  0x61   :  { %1625 = vmatprep.mubr.bf16.mxu0 %v1719_v16  ;;  %1657 = vmatprep.mubr.bf16.mxu1 %v1720_v17 }
  0x68   :  { %1626 = vmatmul.mubr.bf16.gmra.mrb[8].mxu0 %v1721_v18  ;;  %1658 = vmatmul.mubr.bf16.gmra.mrb[8].mxu1 %v1722_v19 }
  0x69   :  { %1629 = vmatprep.mubr.bf16.mxu0 %v1723_v20  ;;  %1661 = vmatprep.mubr.bf16.mxu1 %v1724_v21 }
  0x70   :  { %1630 = vmatmul.mubr.bf16.gmra.mrb[12].mxu0 %v1725_v22  ;;  %1662 = vmatmul.mubr.bf16.gmra.mrb[12].mxu1 %v1726_v23 }
  0x71   :  { %1633 = vmatprep.mubr.bf16.mxu0 %v1727_v24  ;;  %1665 = vmatprep.mubr.bf16.mxu1 %v1728_v25 }
  0x78   :  { %1634 = vmatmul.mubr.bf16.gmra.mrb[16].mxu0 %v1729_v26  ;;  %1666 = vmatmul.mubr.bf16.gmra.mrb[16].mxu1 %v1730_v27 }
  0x79   :  { %1637 = vmatprep.mubr.bf16.mxu0 %v1731_v28  ;;  %1669 = vmatprep.mubr.bf16.mxu1 %v1732_v29 }
  0x80   :  { %1638 = vmatmul.mubr.bf16.gmra.mrb[20].mxu0 %v1733_v30  ;;  %1670 = vmatmul.mubr.bf16.gmra.mrb[20].mxu1 %v1734_v31 }
  0x81   :  { %1641 = vmatprep.mubr.bf16.mxu0 %v1735_v32  ;;  %1673 = vmatprep.mubr.bf16.mxu1 %v1736_v33 }
  0x88   :  { %1642 = vmatmul.mubr.bf16.gmra.mrb[24].mxu0 %v1737_v34  ;;  %1674 = vmatmul.mubr.bf16.gmra.mrb[24].mxu1 %v1738_v35 }
  0x89   :  { %1645 = vmatprep.mubr.bf16.mxu0 %v1739_v36  ;;  %1677 = vmatprep.mubr.bf16.mxu1 %v1740_v37 }
  0x90   :  { %1646 = vmatmul.mubr.bf16.gmra.mrb[28].mxu0 %v1741_v38  ;;  %1678 = vmatmul.mubr.bf16.gmra.mrb[28].mxu1 %v1742_v39 }
 0x12b   :  { %v1619_v41 = vpop.f32.mrb[0].mxu0  ;;  %v1651_v42 = vpop.f32.mrb[0].mxu1 }
 0x12c   :  { %v425_v43 = vadd.f32 %v1619_v41, %v1912_v40  ;;  %v553_v44 = vadd.f32 %v1651_v42, %v1912_v40  ;;  %v416_v45 = vpop.f32.mrb[1].mxu0  ;;  %v544_v46 = vpop.f32.mrb[1].mxu1 }
 0x12d   :  { %v417_v47 = vadd.f32 %v1912_v40, %v416_v45  ;;  %v545_v48 = vadd.f32 %v1912_v40, %v544_v46  ;;  %v1620_v49 = vpop.f32.mrb[2].mxu0  ;;  %v1652_v50 = vpop.f32.mrb[2].mxu1 }
 0x12e   :  { %vm673_vm0 = vcmp.gt.f32.partialorder %v425_v43, 0.0  ;;  %v737_v51 = vmul.f32 0.2, %v425_v43  ;;  %vm705_vm1 = vcmp.gt.f32.partialorder %v553_v44, 0.0  ;;  %v769_v52 = vmul.f32 0.2, %v553_v44 }
 0x12f   :  { %vm671_vm2 = vcmp.gt.f32.partialorder %v417_v47, 0.0  ;;  %v735_v53 = vmul.f32 0.2, %v417_v47  ;;  %vm703_vm3 = vcmp.gt.f32.partialorder %v545_v48, 0.0  ;;  %v767_v54 = vmul.f32 0.2, %v545_v48 }
 0x130   :  { %v428_v55 = vadd.f32 %v1620_v49, %v1912_v40  ;;  %v556_v56 = vadd.f32 %v1652_v50, %v1912_v40  ;;  %v419_v57 = vpop.f32.mrb[3].mxu0  ;;  %v547_v58 = vpop.f32.mrb[3].mxu1  ;;  %v801_v59 = vsel %vm673_vm0, %v425_v43, %v737_v51  ;;  %v833_v60 = vsel %vm705_vm1, %v553_v44, %v769_v52 }
 0x131   :  { %v420_v61 = vadd.f32 %v1912_v40, %v419_v57  ;;  %v548_v62 = vadd.f32 %v1912_v40, %v547_v58  ;;  %v799_v3 = vsel %vm671_vm2, %v417_v47, %v735_v53  ;;  %v831_v4 = vsel %vm703_vm3, %v545_v48, %v767_v54 }
 0x132   :  { %vm674_vm4 = vcmp.gt.f32.partialorder %v428_v55, 0.0  ;;  %v738_v63 = vmul.f32 0.2, %v428_v55  ;;  %vm706_vm5 = vcmp.gt.f32.partialorder %v556_v56, 0.0  ;;  %v770_v0 = vmul.f32 0.2, %v556_v56 }
 0x133   :  { %vm672_vm6 = vcmp.gt.f32.partialorder %v420_v61, 0.0  ;;  %v736_v1 = vmul.f32 0.2, %v420_v61  ;;  %vm704_vm7 = vcmp.gt.f32.partialorder %v548_v62, 0.0  ;;  %v768_v2 = vmul.f32 0.2, %v548_v62 }
 0x134   :  { %v802_v5 = vsel %vm674_vm4, %v428_v55, %v738_v63  ;;  %v834_v6 = vsel %vm706_vm5, %v556_v56, %v770_v0  ;;  %v1623_v7 = vpop.f32.mrb[4].mxu0  ;;  %v1655_v8 = vpop.f32.mrb[4].mxu1 }
 0x135   :  { %v1378_v9 = vpack.c.bf16 %v802_v5, %v801_v59  ;;  %v1458_v10 = vpack.c.bf16 %v834_v6, %v833_v60  ;;  %v800_v11 = vsel %vm672_vm6, %v420_v61, %v736_v1  ;;  %v832_v12 = vsel %vm704_vm7, %v548_v62, %v768_v2  ;;  %v432_v13 = vpop.f32.mrb[5].mxu0  ;;  %v560_v14 = vpop.f32.mrb[5].mxu1 }
 0x136   :  { %v1373_v15 = vpack.c.bf16 %v800_v11, %v799_v3  ;;  %v1453_v16 = vpack.c.bf16 %v832_v12, %v831_v4  ;;  %v441_v17 = vadd.f32 %v1623_v7, %v1912_v40  ;;  %v569_v18 = vadd.f32 %v1655_v8, %v1912_v40  ;;  %v1624_v19 = vpop.f32.mrb[6].mxu0  ;;  %v1656_v20 = vpop.f32.mrb[6].mxu1 }
 0x137   :  { %1530 = vst [vmem:[#allocation8 + $0x8] sm:$0xff] %v1378_v9   ;;  %1546 = vst [vmem:[#allocation8 + $0x88] sm:$0xff] %v1458_v10   ;;  %v433_v21 = vadd.f32 %v1912_v40, %v432_v13  ;;  %v561_v22 = vadd.f32 %v1912_v40, %v560_v14  ;;  %v444_v23 = vadd.f32 %v1624_v19, %v1912_v40  ;;  %v435_v25 = vpop.f32.mrb[7].mxu0  ;;  %v563_v26 = vpop.f32.mrb[7].mxu1 }
 0x138   :  { %v572_v24 = vadd.f32 %v1656_v20, %v1912_v40  ;;  %1374 = vst [vmem:[#allocation8] sm:$0xff] %v1373_v15   ;;  %1545 = vst [vmem:[#allocation8 + $0x80] sm:$0xff] %v1453_v16   ;;  %vm677_vm8 = vcmp.gt.f32.partialorder %v441_v17, 0.0  ;;  %v741_v27 = vmul.f32 0.2, %v441_v17  ;;  %vm709_vm9 = vcmp.gt.f32.partialorder %v569_v18, 0.0 }
 0x139   :  { %v773_v28 = vmul.f32 0.2, %v569_v18  ;;  %vm675_vm10 = vcmp.gt.f32.partialorder %v433_v21, 0.0  ;;  %v739_v29 = vmul.f32 0.2, %v433_v21  ;;  %vm707_vm11 = vcmp.gt.f32.partialorder %v561_v22, 0.0 }
 0x13a   :  { %v771_v30 = vmul.f32 0.2, %v561_v22  ;;  %v805_v31 = vsel %vm677_vm8, %v441_v17, %v741_v27  ;;  %vm678_vm12 = vcmp.gt.f32.partialorder %v444_v23, 0.0  ;;  %v742_v33 = vmul.f32 0.2, %v444_v23 }
 0x13b   :  { %v837_v32 = vsel %vm709_vm9, %v569_v18, %v773_v28  ;;  %v803_v34 = vsel %vm675_vm10, %v433_v21, %v739_v29  ;;  %vm710_vm13 = vcmp.gt.f32.partialorder %v572_v24, 0.0  ;;  %v774_v36 = vmul.f32 0.2, %v572_v24  ;;  %v1627_v37 = vpop.f32.mrb[8].mxu0  ;;  %v1659_v38 = vpop.f32.mrb[8].mxu1 }
 0x13c   :  { %v835_v35 = vsel %vm707_vm11, %v561_v22, %v771_v30  ;;  %v806_v39 = vsel %vm678_vm12, %v444_v23, %v742_v33  ;;  %v436_v41 = vadd.f32 %v1912_v40, %v435_v25  ;;  %v564_v42 = vadd.f32 %v1912_v40, %v563_v26  ;;  %v448_v44 = vpop.f32.mrb[9].mxu0  ;;  %v576_v45 = vpop.f32.mrb[9].mxu1 }
 0x13d   :  { %v457_v43 = vadd.f32 %v1627_v37, %v1912_v40  ;;  %v1388_v46 = vpack.c.bf16 %v806_v39, %v805_v31  ;;  %v838_v47 = vsel %vm710_vm13, %v572_v24, %v774_v36  ;;  %v585_v48 = vadd.f32 %v1659_v38, %v1912_v40  ;;  %v1628_v50 = vpop.f32.mrb[10].mxu0  ;;  %v1660_v51 = vpop.f32.mrb[10].mxu1 }
 0x13e   :  { %v449_v49 = vadd.f32 %v1912_v40, %v448_v44  ;;  %v1468_v52 = vpack.c.bf16 %v838_v47, %v837_v32  ;;  %vm676_vm14 = vcmp.gt.f32.partialorder %v436_v41, 0.0  ;;  %v740_v53 = vmul.f32 0.2, %v436_v41  ;;  %v451_v54 = vpop.f32.mrb[11].mxu0  ;;  %v579_v55 = vpop.f32.mrb[11].mxu1 }
 0x13f   :  { %vm708_vm15 = vcmp.gt.f32.partialorder %v564_v42, 0.0  ;;  %1532 = vst [vmem:[#allocation8 + $0x18] sm:$0xff] %v1388_v46   ;;  %v772_v56 = vmul.f32 0.2, %v564_v42  ;;  %vm681_vm0 = vcmp.gt.f32.partialorder %v457_v43, 0.0  ;;  %vm713_vm1 = vcmp.gt.f32.partialorder %v585_v48, 0.0 }
 0x140   :  { %v745_v57 = vmul.f32 0.2, %v457_v43  ;;  %1548 = vst [vmem:[#allocation8 + $0x98] sm:$0xff] %v1468_v52   ;;  %v804_v58 = vsel %vm676_vm14, %v436_v41, %v740_v53  ;;  %v777_v59 = vmul.f32 0.2, %v585_v48  ;;  %vm679_vm2 = vcmp.gt.f32.partialorder %v449_v49, 0.0 }
 0x141   :  { %v743_v60 = vmul.f32 0.2, %v449_v49  ;;  %v1383_v61 = vpack.c.bf16 %v804_v58, %v803_v34  ;;  %v836_v62 = vsel %vm708_vm15, %v564_v42, %v772_v56  ;;  %v577_v0 = vadd.f32 %v1912_v40, %v576_v45 }
 0x142   :  { %v809_v63 = vsel %vm681_vm0, %v457_v43, %v745_v57  ;;  %v1463_v1 = vpack.c.bf16 %v836_v62, %v835_v35  ;;  %v841_v2 = vsel %vm713_vm1, %v585_v48, %v777_v59  ;;  %v460_v4 = vadd.f32 %v1628_v50, %v1912_v40 }
 0x143   :  { %v807_v3 = vsel %vm679_vm2, %v449_v49, %v743_v60  ;;  %1531 = vst [vmem:[#allocation8 + $0x10] sm:$0xff] %v1383_v61   ;;  %vm711_vm3 = vcmp.gt.f32.partialorder %v577_v0, 0.0  ;;  %v775_v5 = vmul.f32 0.2, %v577_v0  ;;  %v588_v6 = vadd.f32 %v1660_v51, %v1912_v40  ;;  %v1631_v8 = vpop.f32.mrb[12].mxu0  ;;  %v1663_v9 = vpop.f32.mrb[12].mxu1 }
 0x144   :  { %v452_v7 = vadd.f32 %v1912_v40, %v451_v54  ;;  %1547 = vst [vmem:[#allocation8 + $0x90] sm:$0xff] %v1463_v1   ;;  %vm682_vm4 = vcmp.gt.f32.partialorder %v460_v4, 0.0  ;;  %v746_v10 = vmul.f32 0.2, %v460_v4  ;;  %v580_v11 = vadd.f32 %v1912_v40, %v579_v55  ;;  %v464_v13 = vpop.f32.mrb[13].mxu0  ;;  %v592_v14 = vpop.f32.mrb[13].mxu1 }
 0x145   :  { %v473_v12 = vadd.f32 %v1631_v8, %v1912_v40  ;;  %v839_v15 = vsel %vm711_vm3, %v577_v0, %v775_v5  ;;  %vm714_vm5 = vcmp.gt.f32.partialorder %v588_v6, 0.0  ;;  %v778_v16 = vmul.f32 0.2, %v588_v6  ;;  %v1632_v17 = vpop.f32.mrb[14].mxu0  ;;  %v1664_v18 = vpop.f32.mrb[14].mxu1 }
 0x146   :  { %vm680_vm6 = vcmp.gt.f32.partialorder %v452_v7, 0.0  ;;  %v810_v19 = vsel %vm682_vm4, %v460_v4, %v746_v10  ;;  %v744_v20 = vmul.f32 0.2, %v452_v7  ;;  %vm712_vm7 = vcmp.gt.f32.partialorder %v580_v11, 0.0  ;;  %v467_v22 = vpop.f32.mrb[15].mxu0  ;;  %v595_v26 = vpop.f32.mrb[15].mxu1 }
 0x147   :  { %v776_v21 = vmul.f32 0.2, %v580_v11  ;;  %v1398_v23 = vpack.c.bf16 %v810_v19, %v809_v63  ;;  %v842_v24 = vsel %vm714_vm5, %v588_v6, %v778_v16  ;;  %vm685_vm8 = vcmp.gt.f32.partialorder %v473_v12, 0.0 }
 0x148   :  { %v749_v25 = vmul.f32 0.2, %v473_v12  ;;  %v1478_v27 = vpack.c.bf16 %v842_v24, %v841_v2  ;;  %v808_v28 = vsel %vm680_vm6, %v452_v7, %v744_v20  ;;  %v601_v30 = vadd.f32 %v1663_v9, %v1912_v40 }
 0x149   :  { %v840_v29 = vsel %vm712_vm7, %v580_v11, %v776_v21  ;;  %1534 = vst [vmem:[#allocation8 + $0x28] sm:$0xff] %v1398_v23   ;;  %v1393_v31 = vpack.c.bf16 %v808_v28, %v807_v3  ;;  %v465_v34 = vadd.f32 %v1912_v40, %v464_v13  ;;  %v593_v36 = vadd.f32 %v1912_v40, %v592_v14 }
 0x14a   :  { %v1473_v32 = vpack.c.bf16 %v840_v29, %v839_v15  ;;  %v813_v33 = vsel %vm685_vm8, %v473_v12, %v749_v25  ;;  %1550 = vst [vmem:[#allocation8 + $0xa8] sm:$0xff] %v1478_v27   ;;  %vm717_vm9 = vcmp.gt.f32.partialorder %v601_v30, 0.0  ;;  %v781_v35 = vmul.f32 0.2, %v601_v30 }
 0x14b   :  { %v476_v37 = vadd.f32 %v1632_v17, %v1912_v40  ;;  %1533 = vst [vmem:[#allocation8 + $0x20] sm:$0xff] %v1393_v31   ;;  %vm683_vm10 = vcmp.gt.f32.partialorder %v465_v34, 0.0  ;;  %v747_v38 = vmul.f32 0.2, %v465_v34  ;;  %v604_v39 = vadd.f32 %v1664_v18, %v1912_v40  ;;  %v1635_v42 = vpop.f32.mrb[16].mxu0  ;;  %v1667_v43 = vpop.f32.mrb[16].mxu1 }
 0x14c   :  { %1549 = vst [vmem:[#allocation8 + $0xa0] sm:$0xff] %v1473_v32   ;;  %v468_v41 = vadd.f32 %v1912_v40, %v467_v22  ;;  %v845_v44 = vsel %vm717_vm9, %v601_v30, %v781_v35  ;;  %vm715_vm11 = vcmp.gt.f32.partialorder %v593_v36, 0.0  ;;  %v779_v45 = vmul.f32 0.2, %v593_v36  ;;  %v480_v46 = vpop.f32.mrb[17].mxu0  ;;  %v608_v47 = vpop.f32.mrb[17].mxu1 }
 0x14d   :  { %vm686_vm12 = vcmp.gt.f32.partialorder %v476_v37, 0.0  ;;  %v811_v48 = vsel %vm683_vm10, %v465_v34, %v747_v38  ;;  %v750_v49 = vmul.f32 0.2, %v476_v37  ;;  %vm718_vm13 = vcmp.gt.f32.partialorder %v604_v39, 0.0  ;;  %v1636_v51 = vpop.f32.mrb[18].mxu0  ;;  %v1668_v55 = vpop.f32.mrb[18].mxu1 }
 0x14e   :  { %v782_v50 = vmul.f32 0.2, %v604_v39  ;;  %v843_v52 = vsel %vm715_vm11, %v593_v36, %v779_v45  ;;  %vm684_vm14 = vcmp.gt.f32.partialorder %v468_v41, 0.0  ;;  %v748_v53 = vmul.f32 0.2, %v468_v41  ;;  %v483_v56 = vpop.f32.mrb[19].mxu0 }
 0x14f   :  { %v596_v54 = vadd.f32 %v1912_v40, %v595_v26  ;;  %v814_v57 = vsel %vm686_vm12, %v476_v37, %v750_v49  ;;  %v489_v59 = vadd.f32 %v1635_v42, %v1912_v40  ;;  %v617_v60 = vadd.f32 %v1667_v43, %v1912_v40  ;;  %v611_v61 = vpop.f32.mrb[19].mxu1 }
 0x150   :  { %v846_v58 = vsel %vm718_vm13, %v604_v39, %v782_v50  ;;  %v1408_v62 = vpack.c.bf16 %v814_v57, %v813_v33  ;;  %v812_v0 = vsel %vm684_vm14, %v468_v41, %v748_v53  ;;  %v481_v5 = vadd.f32 %v1912_v40, %v480_v46 }
 0x151   :  { %v1488_v63 = vpack.c.bf16 %v846_v58, %v845_v44  ;;  %vm716_vm15 = vcmp.gt.f32.partialorder %v596_v54, 0.0  ;;  %v1403_v1 = vpack.c.bf16 %v812_v0, %v811_v48  ;;  %v780_v2 = vmul.f32 0.2, %v596_v54 }
 0x152   :  { %vm689_vm0 = vcmp.gt.f32.partialorder %v489_v59, 0.0  ;;  %v753_v3 = vmul.f32 0.2, %v489_v59  ;;  %1536 = vst [vmem:[#allocation8 + $0x38] sm:$0xff] %v1408_v62   ;;  %vm721_vm1 = vcmp.gt.f32.partialorder %v617_v60, 0.0  ;;  %v609_v6 = vadd.f32 %v1912_v40, %v608_v47 }
 0x153   :  { %1552 = vst [vmem:[#allocation8 + $0xb8] sm:$0xff] %v1488_v63   ;;  %v785_v4 = vmul.f32 0.2, %v617_v60  ;;  %1535 = vst [vmem:[#allocation8 + $0x30] sm:$0xff] %v1403_v1   ;;  %v844_v7 = vsel %vm716_vm15, %v596_v54, %v780_v2  ;;  %v492_v9 = vadd.f32 %v1636_v51, %v1912_v40  ;;  %v620_v10 = vadd.f32 %v1668_v55, %v1912_v40  ;;  %v1639_v11 = vpop.f32.mrb[20].mxu0  ;;  %v1671_v12 = vpop.f32.mrb[20].mxu1 }
 0x154   :  { %v817_v8 = vsel %vm689_vm0, %v489_v59, %v753_v3  ;;  %v1483_v13 = vpack.c.bf16 %v844_v7, %v843_v52  ;;  %vm687_vm2 = vcmp.gt.f32.partialorder %v481_v5, 0.0  ;;  %v751_v15 = vmul.f32 0.2, %v481_v5  ;;  %v496_v16 = vpop.f32.mrb[21].mxu0  ;;  %v624_v17 = vpop.f32.mrb[21].mxu1 }
 0x155   :  { %v849_v14 = vsel %vm721_vm1, %v617_v60, %v785_v4  ;;  %vm719_vm3 = vcmp.gt.f32.partialorder %v609_v6, 0.0  ;;  %v783_v18 = vmul.f32 0.2, %v609_v6  ;;  %vm690_vm4 = vcmp.gt.f32.partialorder %v492_v9, 0.0  ;;  %v1640_v23 = vpop.f32.mrb[22].mxu0  ;;  %v1672_v24 = vpop.f32.mrb[22].mxu1 }
 0x156   :  { %v754_v19 = vmul.f32 0.2, %v492_v9  ;;  %1551 = vst [vmem:[#allocation8 + $0xb0] sm:$0xff] %v1483_v13   ;;  %v815_v20 = vsel %vm687_vm2, %v481_v5, %v751_v15  ;;  %vm722_vm5 = vcmp.gt.f32.partialorder %v620_v10, 0.0  ;;  %v786_v21 = vmul.f32 0.2, %v620_v10 }
 0x157   :  { %v484_v22 = vadd.f32 %v1912_v40, %v483_v56  ;;  %v847_v25 = vsel %vm719_vm3, %v609_v6, %v783_v18  ;;  %v612_v27 = vadd.f32 %v1912_v40, %v611_v61  ;;  %v505_v28 = vadd.f32 %v1639_v11, %v1912_v40  ;;  %v499_v29 = vpop.f32.mrb[23].mxu0  ;;  %v627_v30 = vpop.f32.mrb[23].mxu1 }
 0x158   :  { %v818_v26 = vsel %vm690_vm4, %v492_v9, %v754_v19  ;;  %v850_v32 = vsel %vm722_vm5, %v620_v10, %v786_v21  ;;  %v633_v38 = vadd.f32 %v1671_v12, %v1912_v40  ;;  %v497_v39 = vadd.f32 %v1912_v40, %v496_v16 }
 0x159   :  { %v1418_v31 = vpack.c.bf16 %v818_v26, %v817_v8  ;;  %vm688_vm6 = vcmp.gt.f32.partialorder %v484_v22, 0.0  ;;  %v752_v33 = vmul.f32 0.2, %v484_v22  ;;  %v1498_v34 = vpack.c.bf16 %v850_v32, %v849_v14 }
 0x15a   :  { %vm720_vm7 = vcmp.gt.f32.partialorder %v612_v27, 0.0  ;;  %v784_v35 = vmul.f32 0.2, %v612_v27  ;;  %vm693_vm8 = vcmp.gt.f32.partialorder %v505_v28, 0.0  ;;  %v757_v37 = vmul.f32 0.2, %v505_v28 }
 0x15b   :  { %1538 = vst [vmem:[#allocation8 + $0x48] sm:$0xff] %v1418_v31   ;;  %v816_v36 = vsel %vm688_vm6, %v484_v22, %v752_v33  ;;  %1554 = vst [vmem:[#allocation8 + $0xc8] sm:$0xff] %v1498_v34   ;;  %v625_v43 = vadd.f32 %v1912_v40, %v624_v17  ;;  %v508_v44 = vadd.f32 %v1640_v23, %v1912_v40  ;;  %v1643_v45 = vpop.f32.mrb[24].mxu0  ;;  %v1675_v46 = vpop.f32.mrb[24].mxu1  ;;  %vm725_vm9 = vcmp.gt.f32.partialorder %v633_v38, 0.0 }
 0x15c   :  { %v1413_v41 = vpack.c.bf16 %v816_v36, %v815_v20  ;;  %v848_v42 = vsel %vm720_vm7, %v612_v27, %v784_v35  ;;  %v789_v48 = vmul.f32 0.2, %v633_v38  ;;  %v512_v49 = vpop.f32.mrb[25].mxu0  ;;  %v640_v50 = vpop.f32.mrb[25].mxu1  ;;  %v821_v51 = vsel %vm693_vm8, %v505_v28, %v757_v37 }
 0x15d   :  { %v1493_v47 = vpack.c.bf16 %v848_v42, %v847_v25  ;;  %vm691_vm10 = vcmp.gt.f32.partialorder %v497_v39, 0.0  ;;  %v755_v52 = vmul.f32 0.2, %v497_v39  ;;  %v787_v53 = vmul.f32 0.2, %v625_v43  ;;  %v1644_v56 = vpop.f32.mrb[26].mxu0 }
 0x15e   :  { %1537 = vst [vmem:[#allocation8 + $0x40] sm:$0xff] %v1413_v41   ;;  %vm723_vm11 = vcmp.gt.f32.partialorder %v625_v43, 0.0  ;;  %vm694_vm12 = vcmp.gt.f32.partialorder %v508_v44, 0.0  ;;  %v758_v54 = vmul.f32 0.2, %v508_v44  ;;  %v636_v55 = vadd.f32 %v1672_v24, %v1912_v40  ;;  %v1676_v57 = vpop.f32.mrb[26].mxu1 }
 0x15f   :  { %1553 = vst [vmem:[#allocation8 + $0xc0] sm:$0xff] %v1493_v47   ;;  %v853_v58 = vsel %vm725_vm9, %v633_v38, %v789_v48  ;;  %v819_v59 = vsel %vm691_vm10, %v497_v39, %v755_v52  ;;  %v500_v60 = vadd.f32 %v1912_v40, %v499_v29  ;;  %v628_v61 = vadd.f32 %v1912_v40, %v627_v30  ;;  %v515_v62 = vpop.f32.mrb[27].mxu0  ;;  %v643_v63 = vpop.f32.mrb[27].mxu1 }
 0x160   :  { %v822_v0 = vsel %vm694_vm12, %v508_v44, %v758_v54  ;;  %vm726_vm13 = vcmp.gt.f32.partialorder %v636_v55, 0.0  ;;  %v790_v1 = vmul.f32 0.2, %v636_v55  ;;  %v521_v2 = vadd.f32 %v1643_v45, %v1912_v40 }
 0x161   :  { %v1428_v3 = vpack.c.bf16 %v822_v0, %v821_v51  ;;  %vm692_vm14 = vcmp.gt.f32.partialorder %v500_v60, 0.0  ;;  %v756_v4 = vmul.f32 0.2, %v500_v60  ;;  %vm724_vm15 = vcmp.gt.f32.partialorder %v628_v61, 0.0 }
 0x162   :  { %v854_v5 = vsel %vm726_vm13, %v636_v55, %v790_v1  ;;  %v788_v6 = vmul.f32 0.2, %v628_v61  ;;  %vm697_vm0 = vcmp.gt.f32.partialorder %v521_v2, 0.0  ;;  %v761_v7 = vmul.f32 0.2, %v521_v2 }
 0x163   :  { %1540 = vst [vmem:[#allocation8 + $0x58] sm:$0xff] %v1428_v3   ;;  %v1508_v8 = vpack.c.bf16 %v854_v5, %v853_v58  ;;  %v820_v9 = vsel %vm692_vm14, %v500_v60, %v756_v4  ;;  %v649_v10 = vadd.f32 %v1675_v46, %v1912_v40  ;;  %v513_v11 = vadd.f32 %v1912_v40, %v512_v49  ;;  %v1647_v12 = vpop.f32.mrb[28].mxu0  ;;  %v1679_v13 = vpop.f32.mrb[28].mxu1 }
 0x164   :  { %v851_v14 = vsel %vm723_vm11, %v625_v43, %v787_v53  ;;  %v1423_v15 = vpack.c.bf16 %v820_v9, %v819_v59  ;;  %v852_v16 = vsel %vm724_vm15, %v628_v61, %v788_v6  ;;  %v641_v17 = vadd.f32 %v1912_v40, %v640_v50  ;;  %v528_v18 = vpop.f32.mrb[29].mxu0  ;;  %v656_v19 = vpop.f32.mrb[29].mxu1 }
 0x165   :  { %1556 = vst [vmem:[#allocation8 + $0xd8] sm:$0xff] %v1508_v8   ;;  %v1503_v20 = vpack.c.bf16 %v852_v16, %v851_v14  ;;  %vm729_vm1 = vcmp.gt.f32.partialorder %v649_v10, 0.0  ;;  %v793_v21 = vmul.f32 0.2, %v649_v10  ;;  %vm695_vm2 = vcmp.gt.f32.partialorder %v513_v11, 0.0  ;;  %v1648_v22 = vpop.f32.mrb[30].mxu0 }
 0x166   :  { %v1680_v23 = vpop.f32.mrb[30].mxu1  ;;  %1539 = vst [vmem:[#allocation8 + $0x50] sm:$0xff] %v1423_v15   ;;  %v825_v24 = vsel %vm697_vm0, %v521_v2, %v761_v7  ;;  %v759_v25 = vmul.f32 0.2, %v513_v11  ;;  %vm727_vm3 = vcmp.gt.f32.partialorder %v641_v17, 0.0  ;;  %v524_v26 = vadd.f32 %v1644_v56, %v1912_v40  ;;  %v531_v27 = vpop.f32.mrb[31].mxu0 }
 0x167   :  { %1555 = vst [vmem:[#allocation8 + $0xd0] sm:$0xff] %v1503_v20   ;;  %v791_v28 = vmul.f32 0.2, %v641_v17  ;;  %v652_v29 = vadd.f32 %v1676_v57, %v1912_v40  ;;  %v516_v30 = vadd.f32 %v1912_v40, %v515_v62  ;;  %v644_v31 = vadd.f32 %v1912_v40, %v643_v63  ;;  %v659_v32 = vpop.f32.mrb[31].mxu1 }
 0x168   :  { %v857_v33 = vsel %vm729_vm1, %v649_v10, %v793_v21  ;;  %v823_v34 = vsel %vm695_vm2, %v513_v11, %v759_v25  ;;  %vm698_vm4 = vcmp.gt.f32.partialorder %v524_v26, 0.0  ;;  %v762_v35 = vmul.f32 0.2, %v524_v26 }
 0x169   :  { %vm730_vm5 = vcmp.gt.f32.partialorder %v652_v29, 0.0  ;;  %v794_v36 = vmul.f32 0.2, %v652_v29  ;;  %vm696_vm6 = vcmp.gt.f32.partialorder %v516_v30, 0.0  ;;  %v760_v37 = vmul.f32 0.2, %v516_v30 }
 0x16a   :  { %v826_v38 = vsel %vm698_vm4, %v524_v26, %v762_v35  ;;  %vm728_vm7 = vcmp.gt.f32.partialorder %v644_v31, 0.0  ;;  %v792_v39 = vmul.f32 0.2, %v644_v31  ;;  %v537_v41 = vadd.f32 %v1647_v12, %v1912_v40 }
 0x16b   :  { %v1438_v42 = vpack.c.bf16 %v826_v38, %v825_v24  ;;  %v858_v43 = vsel %vm730_vm5, %v652_v29, %v794_v36  ;;  %v824_v44 = vsel %vm696_vm6, %v516_v30, %v760_v37  ;;  %v665_v45 = vadd.f32 %v1679_v13, %v1912_v40 }
 0x16c   :  { %v855_v46 = vsel %vm727_vm3, %v641_v17, %v791_v28  ;;  %v1518_v47 = vpack.c.bf16 %v858_v43, %v857_v33  ;;  %v1433_v48 = vpack.c.bf16 %v824_v44, %v823_v34  ;;  %v856_v49 = vsel %vm728_vm7, %v644_v31, %v792_v39 }
 0x16d   :  { %1542 = vst [vmem:[#allocation8 + $0x68] sm:$0xff] %v1438_v42   ;;  %v1513_v50 = vpack.c.bf16 %v856_v49, %v855_v46  ;;  %vm701_vm8 = vcmp.gt.f32.partialorder %v537_v41, 0.0  ;;  %v765_v51 = vmul.f32 0.2, %v537_v41  ;;  %v797_v52 = vmul.f32 0.2, %v665_v45 }
 0x16e   :  { %1558 = vst [vmem:[#allocation8 + $0xe8] sm:$0xff] %v1518_v47   ;;  %1541 = vst [vmem:[#allocation8 + $0x60] sm:$0xff] %v1433_v48   ;;  %v529_v53 = vadd.f32 %v1912_v40, %v528_v18  ;;  %v657_v54 = vadd.f32 %v1912_v40, %v656_v19  ;;  %v540_v55 = vadd.f32 %v1648_v22, %v1912_v40  ;;  %vm733_vm9 = vcmp.gt.f32.partialorder %v665_v45, 0.0 }
 0x16f   :  { %v668_v56 = vadd.f32 %v1680_v23, %v1912_v40  ;;  %1557 = vst [vmem:[#allocation8 + $0xe0] sm:$0xff] %v1513_v50   ;;  %v532_v57 = vadd.f32 %v1912_v40, %v531_v27  ;;  %v660_v58 = vadd.f32 %v1912_v40, %v659_v32  ;;  %v829_v59 = vsel %vm701_vm8, %v537_v41, %v765_v51 }
 0x170   :  { %vm699_vm10 = vcmp.gt.f32.partialorder %v529_v53, 0.0  ;;  %v763_v60 = vmul.f32 0.2, %v529_v53  ;;  %v795_v61 = vmul.f32 0.2, %v657_v54  ;;  %vm702_vm11 = vcmp.gt.f32.partialorder %v540_v55, 0.0 }
 0x171   :  { %v766_v62 = vmul.f32 0.2, %v540_v55  ;;  %vm734_vm12 = vcmp.gt.f32.partialorder %v668_v56, 0.0  ;;  %v798_v63 = vmul.f32 0.2, %v668_v56  ;;  %v861_v0 = vsel %vm733_vm9, %v665_v45, %v797_v52 }
 0x172   :  { %vm731_vm13 = vcmp.gt.f32.partialorder %v657_v54, 0.0  ;;  %vm700_vm14 = vcmp.gt.f32.partialorder %v532_v57, 0.0  ;;  %v764_v1 = vmul.f32 0.2, %v532_v57  ;;  %vm732_vm15 = vcmp.gt.f32.partialorder %v660_v58, 0.0 }
 0x173   :  { %v830_v2 = vsel %vm702_vm11, %v540_v55, %v766_v62  ;;  %v862_v3 = vsel %vm734_vm12, %v668_v56, %v798_v63  ;;  %v796_v4 = vmul.f32 0.2, %v660_v58  ;;  %v827_v40 = vsel %vm699_vm10, %v529_v53, %v763_v60 }
 0x174   :  { %v1448_v5 = vpack.c.bf16 %v830_v2, %v829_v59  ;;  %v1528_v6 = vpack.c.bf16 %v862_v3, %v861_v0  ;;  %v828_v7 = vsel %vm700_vm14, %v532_v57, %v764_v1  ;;  %v859_v8 = vsel %vm731_vm13, %v657_v54, %v795_v61 }
 0x175   :  { %v1443_v9 = vpack.c.bf16 %v828_v7, %v827_v40  ;;  %v860_v10 = vsel %vm732_vm15, %v660_v58, %v796_v4 }
 0x176   :  { %1544 = vst [vmem:[#allocation8 + $0x78] sm:$0xff] %v1448_v5   ;;  %1560 = vst [vmem:[#allocation8 + $0xf8] sm:$0xff] %v1528_v6   ;;  %v1523_v11 = vpack.c.bf16 %v860_v10, %v859_v8 }
 0x177   :  { %1543 = vst [vmem:[#allocation8 + $0x70] sm:$0xff] %v1443_v9  }
 0x178   :  { %1559 = vst [vmem:[#allocation8 + $0xf0] sm:$0xff] %v1523_v11  }
 0x179   :  { %1820 = shalt.err (!%p1817_p0)
}
 0x17a   :  { %s1821_s28 = scalar_lea.hbm %s2006_s3, 4096 }
 0x17b   :  { %p1822_p1 = scmp.ne.s32.totalorder %s2006_s3, %s1821_s28  ;;  %p1825_p2 = scmp.lt.u32.totalorder %s1821_s28, %s2006_s3 }
 0x17d   :  { %p1827_p3 = pnand %p1825_p2, %p1822_p1 }
 0x17f   :  { %1830 = shalt.err (!%p1827_p3)
}
 0x180   :  { %1194 = dma.vmem_to_hbm [thread:$0]  %s1189_s22, 4096, %s2006_s3, [#allocation4], %s1839_s24, %s1839_s24, %s1840_s25  }
 0x181   :  { %1835 = dma.done.wait [#allocation4], 4096  }
 0x182   :  { %1836 = vsyncadd [#allocation4], 4294963200 }
 0x183   :  { %1198 = vsyncpa [#allocation3], 1 }
 0x184   :  { %1199 = vsyncpa [#allocation6], 1 }
 0x185   :  { %1200 = vsyncpa [#allocation4], 1 }

</bundles_post_ra>
